<compile_context>
chip_gen: v7x
topology: tpu7x:2x2x1
jax: 0.10.0
libtpu: 0.0.40
codegen_flags: <defaults>
</compile_context>

<pallas_src>
import math
import jax
import jax.numpy as jnp
from jax.experimental import pallas as pl
from jax.experimental.pallas import tpu as pltpu

EXPANSION = 4
BN_EPS = 1e-5
ACT_DTYPE = jnp.bfloat16      # inter-layer activation storage dtype (f32 math in-kernel)

MAX_TM = 256                  # matmul tile caps (review: 256x256 output, K up to 512)
MAX_TN = 256
MAX_TK = 512
ROW_BLOCK_BYTES = 2 << 20     # target f32-equivalent bytes per elementwise row block
MAX_TROW = 512


# ----------------------------------------------------------------------------
# Helpers (static shape math)
# ----------------------------------------------------------------------------
def _round_up(x, m):
    return ((x + m - 1) // m) * m


def _pick_tile(padded, cap, quantum):
    """Largest multiple of `quantum`, <= cap, dividing `padded` (padded % quantum == 0)."""
    t = min(cap, padded)
    t = max(quantum, (t // quantum) * quantum)
    while padded % t:
        t -= quantum
    return t


def _row_tile(mp, np_, cap_rows=MAX_TROW, cap_bytes=ROW_BLOCK_BYTES):
    limit = max(8, (cap_bytes // (np_ * 4)) // 8 * 8)
    t = min(cap_rows, mp, limit)
    t = max(8, (t // 8) * 8)
    while mp % t:
        t -= 8
    return t


def _pad_to(x, rows, cols):
    pr, pc = rows - x.shape[0], cols - x.shape[1]
    if pr == 0 and pc == 0:
        return x
    return jnp.pad(x, ((0, pr), (0, pc)))


# ----------------------------------------------------------------------------
# Pallas kernels
# ----------------------------------------------------------------------------
def matmul_stats_kernel(a_ref, b_ref, o_ref, sum_ref, sq_ref, acc_ref):
    # grid = (j over N blocks [parallel], i over M blocks, k over K blocks)
    i = pl.program_id(1)
    k = pl.program_id(2)

    @pl.when(k == 0)
    def _():
        acc_ref[...] = jnp.zeros_like(acc_ref)

    @pl.when((i == 0) & (k == 0))
    def _():
        sum_ref[...] = jnp.zeros_like(sum_ref)
        sq_ref[...] = jnp.zeros_like(sq_ref)

    acc_ref[...] += jnp.dot(a_ref[...], b_ref[...],
                            preferred_element_type=jnp.float32)

    @pl.when(k == pl.num_programs(2) - 1)
    def _():
        acc = acc_ref[...]
        o_ref[...] = acc.astype(o_ref.dtype)
        # Fused BN statistics: padded M rows are exactly zero (zero-padded A),
        # so they contribute nothing; divide by the true row count outside.
        sum_ref[...] += jnp.sum(acc, axis=0, keepdims=True)
        sq_ref[...] += jnp.sum(acc * acc, axis=0, keepdims=True)


def make_bn_act_kernel(relu: bool):
    def kernel(x_ref, scale_ref, shift_ref, o_ref):
        y = x_ref[...].astype(jnp.float32) * scale_ref[...] + shift_ref[...]
        if relu:
            y = jnp.maximum(y, 0.0)
        o_ref[...] = y.astype(o_ref.dtype)
    return kernel


def bn_add_relu_kernel(x_ref, res_ref, scale_ref, shift_ref, o_ref):
    y = (x_ref[...].astype(jnp.float32) * scale_ref[...] + shift_ref[...]
         + res_ref[...].astype(jnp.float32))
    o_ref[...] = jnp.maximum(y, 0.0).astype(o_ref.dtype)


def avgpool_kernel(x_ref, o_ref):
    # x: [B, H*W, C] -> mean over spatial positions (f32 accumulation)
    o_ref[...] = jnp.mean(x_ref[...].astype(jnp.float32), axis=1)


def linear_logsoftmax_kernel(x_ref, w_ref, b_ref, o_ref):
    logits = jnp.dot(x_ref[...], w_ref[...],
                     preferred_element_type=jnp.float32) + b_ref[...]
    m = jnp.max(logits, axis=-1, keepdims=True)
    lse = jnp.log(jnp.sum(jnp.exp(logits - m), axis=-1, keepdims=True)) + m
    o_ref[...] = logits - lse


# ----------------------------------------------------------------------------
# Pallas-call wrappers
# ----------------------------------------------------------------------------
def pallas_matmul_stats(a, b):
    """a: [M, K], b: [K, N] -> (out [Mp, Np] ACT_DTYPE, colsum (1,Np) f32, colsumsq (1,Np) f32).

    bf16 operands, f32 accumulation. Per-column sum / sum-of-squares are accumulated
    in the matmul epilogue so the conv output is not re-read from HBM for BN stats.
    """
    M, K = a.shape
    _, N = b.shape
    Mp = _round_up(M, 8)
    Kp = _round_up(K, 128)
    Np = _round_up(N, 128)
    TM = _pick_tile(Mp, MAX_TM, 8)
    TN = _pick_tile(Np, MAX_TN, 128)
    TK = _pick_tile(Kp, MAX_TK, 128)

    ap = _pad_to(a.astype(jnp.bfloat16), Mp, Kp)
    bp = _pad_to(b.astype(jnp.bfloat16), Kp, Np)

    out, s, sq = pl.pallas_call(
        matmul_stats_kernel,
        out_shape=(jax.ShapeDtypeStruct((Mp, Np), ACT_DTYPE),
                   jax.ShapeDtypeStruct((1, Np), jnp.float32),
                   jax.ShapeDtypeStruct((1, Np), jnp.float32)),
        grid_spec=pltpu.PrefetchScalarGridSpec(
            num_scalar_prefetch=0,
            grid=(Np // TN, Mp // TM, Kp // TK),      # (j, i, k)
            in_specs=[pl.BlockSpec((TM, TK), lambda j, i, k: (i, k)),
                      pl.BlockSpec((TK, TN), lambda j, i, k: (k, j))],
            out_specs=(pl.BlockSpec((TM, TN), lambda j, i, k: (i, j)),
                       pl.BlockSpec((1, TN), lambda j, i, k: (0, j)),
                       pl.BlockSpec((1, TN), lambda j, i, k: (0, j))),
            scratch_shapes=[pltpu.VMEM((TM, TN), jnp.float32)]),
        compiler_params=pltpu.CompilerParams(
            dimension_semantics=("parallel", "arbitrary", "arbitrary")),
    )(ap, bp)
    return out, s, sq, Mp, Np


def pallas_bn_apply(xp, scale, shift, relu, residual_p=None):
    """xp: [Mp, Np] ACT_DTYPE; scale/shift: (1, Np) f32. Returns [Mp, Np] ACT_DTYPE."""
    Mp, Np = xp.shape
    TR = _row_tile(Mp, Np)
    if residual_p is None:
        kernel = make_bn_act_kernel(relu)
        in_specs = [pl.BlockSpec((TR, Np), lambda i: (i, 0)),
                    pl.BlockSpec((1, Np), lambda i: (0, 0)),
                    pl.BlockSpec((1, Np), lambda i: (0, 0))]
        args = (xp, scale, shift)
    else:
        kernel = bn_add_relu_kernel
        in_specs = [pl.BlockSpec((TR, Np), lambda i: (i, 0)),
                    pl.BlockSpec((TR, Np), lambda i: (i, 0)),
                    pl.BlockSpec((1, Np), lambda i: (0, 0)),
                    pl.BlockSpec((1, Np), lambda i: (0, 0))]
        args = (xp, residual_p, scale, shift)
    return pl.pallas_call(
        kernel,
        out_shape=jax.ShapeDtypeStruct((Mp, Np), ACT_DTYPE),
        grid_spec=pltpu.PrefetchScalarGridSpec(
            num_scalar_prefetch=0,
            grid=(Mp // TR,),
            in_specs=in_specs,
            out_specs=pl.BlockSpec((TR, Np), lambda i: (i, 0))),
        compiler_params=pltpu.CompilerParams(dimension_semantics=("parallel",)),
    )(*args)


# ----------------------------------------------------------------------------
# Conv / BN building blocks (glue = im2col, Pallas = matmul+stats, BN-apply)
# ----------------------------------------------------------------------------
def _im2col(x, kh, kw, stride, pad):
    """x: [B,H,W,C] NHWC -> patches [B*Ho*Wo, kh*kw*C] ordered (kh, kw, cin)."""
    xp = jnp.pad(x, ((0, 0), (pad, pad), (pad, pad), (0, 0)))
    B, Hp, Wp, C = xp.shape
    Ho = (Hp - kh) // stride + 1
    Wo = (Wp - kw) // stride + 1
    cols = []
    for i in range(kh):
        for j in range(kw):
            cols.append(xp[:, i:i + stride * (Ho - 1) + 1:stride,
                           j:j + stride * (Wo - 1) + 1:stride, :])
    if len(cols) == 1:
        patches = cols[0]
    else:
        patches = jnp.concatenate(cols, axis=-1)      # [B, Ho, Wo, kh*kw*C]
    return patches.reshape(B * Ho * Wo, kh * kw * C), (B, Ho, Wo)


def conv_bn(x, w, gamma, beta, stride, padding, relu=True, residual=None):
    """Conv2d(bias=False) + BatchNorm2d (batch stats) + optional residual + optional ReLU.

    x: [B,H,W,Cin] NHWC (ACT_DTYPE), w: [Cout,Cin,KH,KW] (PyTorch layout).
    """
    Cout, Cin, KH, KW = w.shape
    a, (B, Ho, Wo) = _im2col(x, KH, KW, stride, padding)
    M, K = a.shape
    wf = jnp.transpose(w, (2, 3, 1, 0)).reshape(K, Cout)

    yp, csum, csq, Mp, Np = pallas_matmul_stats(a, wf)

    # BN statistics over the true M rows (padded rows contribute exactly zero).
    mean = csum[:, :Cout] / M
    var = jnp.maximum(csq[:, :Cout] / M - mean * mean, 0.0)   # clamp: avoid NaN from cancellation
    scale = gamma.reshape(1, -1) * jax.lax.rsqrt(var + BN_EPS)
    shift = beta.reshape(1, -1) - mean * scale
    if Np != Cout:
        scale = jnp.pad(scale, ((0, 0), (0, Np - Cout)))
        shift = jnp.pad(shift, ((0, 0), (0, Np - Cout)))

    residual_p = None
    if residual is not None:
        residual_p = residual.reshape(M, Cout)
        if (Mp, Np) != (M, Cout):
            residual_p = jnp.pad(residual_p, ((0, Mp - M), (0, Np - Cout)))

    out = pallas_bn_apply(yp, scale, shift, relu, residual_p)
    if (Mp, Np) != (M, Cout):
        out = out[:M, :Cout]
    return out.reshape(B, Ho, Wo, Cout)


def bottleneck(x, blk):
    stride = blk['stride']
    out = conv_bn(x, blk['w1'], *blk['bn1'], stride=1, padding=0, relu=True)
    out = conv_bn(out, blk['w2'], *blk['bn2'], stride=stride, padding=1, relu=True)
    if 'ws' in blk:
        shortcut = conv_bn(x, blk['ws'], *blk['bns'], stride=stride, padding=0, relu=False)
    else:
        shortcut = x
    out = conv_bn(out, blk['w3'], *blk['bn3'], stride=1, padding=0,
                  relu=True, residual=shortcut)
    return out


# ----------------------------------------------------------------------------
# Parameter init (deterministic, synthetic)
# ----------------------------------------------------------------------------
def _conv_init(key, cout, cin, kh, kw):
    fan_in = cin * kh * kw
    return jax.random.normal(key, (cout, cin, kh, kw), jnp.float32) / math.sqrt(fan_in)


def _bn_init(c):
    return (jnp.ones((c,), jnp.float32), jnp.zeros((c,), jnp.float32))


def init_params(num_blocks, num_classes=10, seed=0):
    keys = iter(jax.random.split(jax.random.PRNGKey(seed), 128))
    p = {}
    p['conv1'] = _conv_init(next(keys), 64, 3, 3, 3)
    p['bn1'] = _bn_init(64)

    in_planes = 64
    layers = []
    for planes, nb, stride in [(64, num_blocks[0], 1), (128, num_blocks[1], 2),
                               (256, num_blocks[2], 2), (512, num_blocks[3], 2)]:
        blocks = []
        for s in [stride] + [1] * (nb - 1):
            blk = {'stride': s}
            blk['w1'] = _conv_init(next(keys), planes, in_planes, 1, 1)
            blk['bn1'] = _bn_init(planes)
            blk['w2'] = _conv_init(next(keys), planes, planes, 3, 3)
            blk['bn2'] = _bn_init(planes)
            blk['w3'] = _conv_init(next(keys), EXPANSION * planes, planes, 1, 1)
            blk['bn3'] = _bn_init(EXPANSION * planes)
            if s != 1 or in_planes != EXPANSION * planes:
                blk['ws'] = _conv_init(next(keys), EXPANSION * planes, in_planes, 1, 1)
                blk['bns'] = _bn_init(EXPANSION * planes)
            in_planes = EXPANSION * planes
            blocks.append(blk)
        layers.append(blocks)
    p['layers'] = layers

    fc_in = 512 * EXPANSION
    p['fc_w'] = jax.random.normal(next(keys), (fc_in, num_classes),
                                  jnp.float32) / math.sqrt(fc_in)
    p['fc_b'] = jnp.zeros((num_classes,), jnp.float32)
    return p


# ----------------------------------------------------------------------------
# Full forward pass
# ----------------------------------------------------------------------------
def resnet_forward(x_nchw, p):
    # layout: convert PyTorch NCHW -> NHWC for all internal compute; activations in bf16.
    x = jnp.transpose(x_nchw, (0, 2, 3, 1)).astype(ACT_DTYPE)

    x = conv_bn(x, p['conv1'], *p['bn1'], stride=1, padding=1, relu=True)
    for blocks in p['layers']:
        for blk in blocks:
            x = bottleneck(x, blk)

    B, H, W, C = x.shape  # expect H = W = 4, C = 2048
    pooled = pl.pallas_call(
        avgpool_kernel,
        out_shape=jax.ShapeDtypeStruct((B, C), jnp.float32),
    )(x.reshape(B, H * W, C))         # this reshape/pool feeds the Reshape(-1, 2048) view

    num_classes = p['fc_w'].shape[1]
    out = pl.pallas_call(
        linear_logsoftmax_kernel,
        out_shape=jax.ShapeDtypeStruct((B, num_classes), jnp.float32),
    )(pooled, p['fc_w'], p['fc_b'].reshape(1, -1))
    return out


# ----------------------------------------------------------------------------
if __name__ == "__main__":
    # CIFAR-style input: spatial 32 so that the 4x4 feature map / Reshape(-1, 2048)
    # structure holds after three stride-2 stages. Small batch, small depth [1,1,1,1].
    num_blocks = [1, 1, 1, 1]
    params = init_params(num_blocks, num_classes=10, seed=0)

    key = jax.random.PRNGKey(0)
    x = jax.random.normal(key, (2, 3, 32, 32), jnp.float32)  # NCHW, like PyTorch

    out = resnet_forward(x, params)
    out = jax.block_until_ready(out)

    assert out.shape == (2, 10), out.shape
    # log-softmax rows must exponentiate-sum to 1
    sums = jnp.sum(jnp.exp(out), axis=1)
    assert bool(jnp.all(jnp.abs(sums - 1.0) < 1e-3)), sums
    print("KERNEL_OK")
</pallas_src>

<mosaic_0001>
module attributes {stable_mosaic.version = 11 : i64} {
  func.func @matmul_stats_kernel(%arg0: i32, %arg1: i32, %arg2: i32, %arg3: memref<256x128xbf16, #tpu.memory_space<vmem>>, %arg4: memref<128x128xbf16, #tpu.memory_space<vmem>>, %arg5: memref<256x128xbf16, #tpu.memory_space<vmem>>, %arg6: memref<1x128xf32, #tpu.memory_space<vmem>>, %arg7: memref<1x128xf32, #tpu.memory_space<vmem>>, %arg8: memref<256x128xf32, #tpu.memory_space<vmem>>) attributes {dimension_semantics = [#tpu.dimension_semantics<parallel>, #tpu.dimension_semantics<arbitrary>, #tpu.dimension_semantics<arbitrary>], iteration_bounds = array<i64: 1, 8, 1>, scalar_prefetch = 0 : i64, scratch_operands = 1 : i64, tpu.core_type = #tpu.core_type<tc>, window_params = [{transform_indices = @transform_0, window_bounds = array<i64: 256, 128>}, {transform_indices = @transform_1, window_bounds = array<i64: 128, 128>}, {transform_indices = @transform_2, window_bounds = array<i64: 256, 128>}, {transform_indices = @transform_3, window_bounds = array<i64: 1, 128>}, {transform_indices = @transform_4, window_bounds = array<i64: 1, 128>}]} {
    %c0_i32 = arith.constant 0 : i32
    %0 = arith.cmpi eq, %arg2, %c0_i32 : i32
    %1 = arith.extui %0 : i1 to i32
    %c0_i32_0 = arith.constant 0 : i32
    %2 = arith.cmpi ne, %1, %c0_i32_0 : i32
    scf.if %2 {
      %cst_13 = arith.constant 0.000000e+00 : f32
      %17 = vector.broadcast %cst_13 : f32 to vector<256x128xf32>
      %c0_14 = arith.constant 0 : index
      %c0_15 = arith.constant 0 : index
      %18 = vector.load %arg8[%c0_14, %c0_15] : memref<256x128xf32, #tpu.memory_space<vmem>>, vector<256x128xf32>
      tpu.vector_store %arg8[%c0_14, %c0_15], %17 {strides = array<i32>} : memref<256x128xf32, #tpu.memory_space<vmem>>, vector<256x128xf32>,
    } else {
    }
    %c0_i32_1 = arith.constant 0 : i32
    %3 = arith.cmpi eq, %arg1, %c0_i32_1 : i32
    %c0_i32_2 = arith.constant 0 : i32
    %4 = arith.cmpi eq, %arg2, %c0_i32_2 : i32
    %5 = arith.andi %3, %4 : i1
    %6 = arith.extui %5 : i1 to i32
    %c0_i32_3 = arith.constant 0 : i32
    %7 = arith.cmpi ne, %6, %c0_i32_3 : i32
    scf.if %7 {
      %cst_13 = arith.constant 0.000000e+00 : f32
      %17 = vector.broadcast %cst_13 : f32 to vector<1x128xf32>
      %c0_14 = arith.constant 0 : index
      %c0_15 = arith.constant 0 : index
      %18 = vector.load %arg6[%c0_14, %c0_15] : memref<1x128xf32, #tpu.memory_space<vmem>>, vector<1x128xf32>
      tpu.vector_store %arg6[%c0_14, %c0_15], %17 {strides = array<i32>} : memref<1x128xf32, #tpu.memory_space<vmem>>, vector<1x128xf32>,
      %cst_16 = arith.constant 0.000000e+00 : f32
      %19 = vector.broadcast %cst_16 : f32 to vector<1x128xf32>
      %c0_17 = arith.constant 0 : index
      %c0_18 = arith.constant 0 : index
      %20 = vector.load %arg7[%c0_17, %c0_18] : memref<1x128xf32, #tpu.memory_space<vmem>>, vector<1x128xf32>
      tpu.vector_store %arg7[%c0_17, %c0_18], %19 {strides = array<i32>} : memref<1x128xf32, #tpu.memory_space<vmem>>, vector<1x128xf32>,
    } else {
    }
    %c0 = arith.constant 0 : index
    %c0_4 = arith.constant 0 : index
    %8 = vector.load %arg8[%c0, %c0_4] : memref<256x128xf32, #tpu.memory_space<vmem>>, vector<256x128xf32>
    %c0_5 = arith.constant 0 : index
    %c0_6 = arith.constant 0 : index
    %9 = vector.load %arg3[%c0_5, %c0_6] : memref<256x128xbf16, #tpu.memory_space<vmem>>, vector<256x128xbf16>
    %c0_7 = arith.constant 0 : index
    %c0_8 = arith.constant 0 : index
    %10 = vector.load %arg4[%c0_7, %c0_8] : memref<128x128xbf16, #tpu.memory_space<vmem>>, vector<128x128xbf16>
    %cst = arith.constant dense<0.000000e+00> : vector<256x128xf32>
    %11 = tpu.matmul %9, %10, %cst {dimension_numbers = #tpu.dot_dimension_numbers<[1], [0], [0], [1], [0, 0, 1, 1], [], []>} : vector<256x128xbf16>, vector<128x128xbf16>, vector<256x128xf32> -> vector<256x128xf32>
    %12 = arith.addf %8, %11 : vector<256x128xf32>
    %c0_9 = arith.constant 0 : index
    %c0_10 = arith.constant 0 : index
    %13 = vector.load %arg8[%c0_9, %c0_10] : memref<256x128xf32, #tpu.memory_space<vmem>>, vector<256x128xf32>
    tpu.vector_store %arg8[%c0_9, %c0_10], %12 {strides = array<i32>} : memref<256x128xf32, #tpu.memory_space<vmem>>, vector<256x128xf32>,
    %c0_i32_11 = arith.constant 0 : i32
    %14 = arith.cmpi eq, %arg2, %c0_i32_11 : i32
    %15 = arith.extui %14 : i1 to i32
    %c0_i32_12 = arith.constant 0 : i32
    %16 = arith.cmpi ne, %15, %c0_i32_12 : i32
    scf.if %16 {
      %c0_13 = arith.constant 0 : index
      %c0_14 = arith.constant 0 : index
      %17 = vector.load %arg8[%c0_13, %c0_14] : memref<256x128xf32, #tpu.memory_space<vmem>>, vector<256x128xf32>
      %18 = arith.truncf %17 : vector<256x128xf32> to vector<256x128xbf16>
      %c0_15 = arith.constant 0 : index
      %c0_16 = arith.constant 0 : index
      %19 = vector.load %arg5[%c0_15, %c0_16] : memref<256x128xbf16, #tpu.memory_space<vmem>>, vector<256x128xbf16>
      tpu.vector_store %arg5[%c0_15, %c0_16], %18 {strides = array<i32>} : memref<256x128xbf16, #tpu.memory_space<vmem>>, vector<256x128xbf16>,
      %c0_17 = arith.constant 0 : index
      %c0_18 = arith.constant 0 : index
      %20 = vector.load %arg6[%c0_17, %c0_18] : memref<1x128xf32, #tpu.memory_space<vmem>>, vector<1x128xf32>
      %cst_19 = arith.constant dense<0.000000e+00> : vector<128xf32>
      %21 = vector.multi_reduction <add>, %17, %cst_19 [0] : vector<256x128xf32> to vector<128xf32>
      %22 = vector.shape_cast %21 : vector<128xf32> to vector<1x128xf32>
      %23 = arith.addf %20, %22 : vector<1x128xf32>
      %c0_20 = arith.constant 0 : index
      %c0_21 = arith.constant 0 : index
      %24 = vector.load %arg6[%c0_20, %c0_21] : memref<1x128xf32, #tpu.memory_space<vmem>>, vector<1x128xf32>
      tpu.vector_store %arg6[%c0_20, %c0_21], %23 {strides = array<i32>} : memref<1x128xf32, #tpu.memory_space<vmem>>, vector<1x128xf32>,
      %c0_22 = arith.constant 0 : index
      %c0_23 = arith.constant 0 : index
      %25 = vector.load %arg7[%c0_22, %c0_23] : memref<1x128xf32, #tpu.memory_space<vmem>>, vector<1x128xf32>
      %26 = arith.mulf %17, %17 : vector<256x128xf32>
      %cst_24 = arith.constant dense<0.000000e+00> : vector<128xf32>
      %27 = vector.multi_reduction <add>, %26, %cst_24 [0] : vector<256x128xf32> to vector<128xf32>
      %28 = vector.shape_cast %27 : vector<128xf32> to vector<1x128xf32>
      %29 = arith.addf %25, %28 : vector<1x128xf32>
      %c0_25 = arith.constant 0 : index
      %c0_26 = arith.constant 0 : index
      %30 = vector.load %arg7[%c0_25, %c0_26] : memref<1x128xf32, #tpu.memory_space<vmem>>, vector<1x128xf32>
      tpu.vector_store %arg7[%c0_25, %c0_26], %29 {strides = array<i32>} : memref<1x128xf32, #tpu.memory_space<vmem>>, vector<1x128xf32>,
    } else {
    }
    return
  }
  func.func @transform_0(%arg0: i32, %arg1: i32, %arg2: i32) -> (i32, i32) {
    %c0_i32 = arith.constant 0 : i32
    return %arg1, %arg2 : i32, i32
  }
  func.func @transform_1(%arg0: i32, %arg1: i32, %arg2: i32) -> (i32, i32) {
    %c0_i32 = arith.constant 0 : i32
    return %arg2, %arg0 : i32, i32
  }
  func.func @transform_2(%arg0: i32, %arg1: i32, %arg2: i32) -> (i32, i32) {
    %c0_i32 = arith.constant 0 : i32
    return %arg1, %arg0 : i32, i32
  }
  func.func @transform_3(%arg0: i32, %arg1: i32, %arg2: i32) -> (i32, i32) {
    %c0_i32 = arith.constant 0 : i32
    %c0_i32_0 = arith.constant 0 : i32
    return %c0_i32, %arg0 : i32, i32
  }
  func.func @transform_4(%arg0: i32, %arg1: i32, %arg2: i32) -> (i32, i32) {
    %c0_i32 = arith.constant 0 : i32
    %c0_i32_0 = arith.constant 0 : i32
    return %c0_i32, %arg0 : i32, i32
  }
}

</mosaic_0001>

<bundles_post_ra>
// kernel: tpu_custom_call.1
= control target key start
LH: loop header
LB: loop body
LE: loop exit
PB: predicated region body
PF: predicated region fallthrough
CT: control target
= control target key end

     0   :  { %10 = vsyncpa [#allocation4], 0  ;;  %s2321_s0 = inlined_call_operand.hbm [shape: bf16[2048,128], index: 0, kind: input, shape index: {}]   ;;  %s2322_s1 = inlined_call_operand.hbm [shape: bf16[128,128], index: 1, kind: input, shape index: {}]   ;;  %s2323_s2 = inlined_call_operand.hbm [shape: bf16[2048,128], index: 2, kind: output, shape index: {0}]   ;;  %s2324_s3 = inlined_call_operand.hbm [shape: f32[1,128], index: 3, kind: output, shape index: {1}]   ;;  %s2325_s4 = inlined_call_operand.hbm [shape: f32[1,128], index: 4, kind: output, shape index: {2}]  }
   0x1   :  { %12 = vsyncpa [#allocation4 + $0x1], 0 }
   0x2   :  { %13 = vsyncpa [#allocation7], 0 }
   0x3   :  { %14 = vsyncpa [#allocation5], 0 }
   0x4   :  { %16 = vsyncpa [#allocation5 + $0x1], 0 }
   0x5   :  { %17 = vsyncpa [#allocation10], 0  ;;  %s1894_s15 = smov 0   ;;  %s1896_s16 = smov 0  }
   0x6   :  { %s1898_s17 = smov 0   ;;  %s1900_s18 = smov 0  }
   0x7   :  { %s1902_s19 = smov 0   ;;  %s1904_s20 = smov 0  }
   0x8 LB: > { %s1243_s21 = sadd.s32 4294967295, %s1856_s20   ;;  %s1244_s22 = sadd.s32 4294967294, %s1856_s20   ;;  %s1856_s20 = sphi %s1904_s20, %s23_s20   ;;  %s1852_s19 = sphi %s1902_s19, %s2352_s19   ;;  %s1848_s18 = sphi %s1900_s18, %s2351_s18   ;;  %s1844_s17 = sphi %s1898_s17, %s2350_s17   ;;  %s1840_s16 = sphi %s1896_s16, %s2349_s16   ;;  %s1836_s15 = sphi %s1894_s15, %s2348_s15  }
   0x9   : > { %p64_p0 = scmp.ne.s32.totalorder %s1840_s16, %s1836_s15  ;;  %p1928_p1 = scmp.eq.s32.totalorder %s1243_s21, 0 }
   0xa   : > { %p1932_p2 = scmp.eq.s32.totalorder %s1243_s21, 7  ;;  %p124_p3 = scmp.eq.s32.totalorder %s1244_s22, 7 }
   0xb   : > { %s2332_s23 = scalar_select %p1928_p1, 1, 0 }
   0xc   : > { %s2333_s24 = scalar_select %p1932_p2, 1, 0 }
   0xd   : > { %p1938_p4 = por %p1928_p1, %p64_p0  ;;  %p1245_p5 = scmp.ge.s32.totalorder %s1856_s20, 1 }
   0xe   : > { %p1943_p6 = por %p124_p3, %p64_p0  ;;  %p183_p7 = scmp.lt.s32.totalorder %s1856_s20, 9 }
   0xf   : > { %s2334_s25 = scalar_select %p1938_p4, 1, 0 }
  0x10   : > { %s2335_s26 = scalar_select %p1943_p6, 1, 0 }
  0x11   : > { %p1948_p8 = pnand %p1245_p5, %p183_p7  ;;  %s1858_s28 = smov [#allocation6]  }
  0x12   : > { %s199_s29 = sshll.u32 %s1858_s28, 4  ;;  %s38_s5 = sadd.s32 1, %s1852_s19  ;;  %s200_s29 = int_to_ptr.vmem [resolvable:$true] %s199_s29 }
  0x13   : > { %s2336_s27 = scalar_select %p1948_p8, 1, 0 }
  0x14   : > { %p1555_p9 = pneg %p1948_p8  ;;  %s1656_s8 = scalar_lea.hbm %s2322_s1, 1024 }
  0x15   : > { %p1657_p11 = scmp.ne.s32.totalorder %s2322_s1, %s1656_s8  ;;  %p1663_p3 = scmp.lt.u32.totalorder %s1656_s8, %s2322_s1 }
  0x16   : > { %p1956_p10 = pnand %p1555_p9, %p1928_p1 }
  0x18   : > { %p1658_p12 = pneg %p1956_p10 }
  0x1a   : > { %p1659_p13 = pnand %p1658_p12, %p1657_p11 }
  0x1c   : > { %p1660_p0 = pneg %p1659_p13 }
  0x1e   : > { %p1665_p5 = pnand %p1663_p3, %p1660_p0 }
  0x20   : > { %1668 = shalt.err (!%p1665_p5)
}
  0x21   : > { %s1669_s13 = scalar_lea.vmem %s200_s29, 1024  ;;  %p1677_p1 = scmp.lt.s32.totalorder %s200_s29, %s200_s29 }
  0x22   : > { %p1670_p7 = scmp.ne.s32.totalorder %s200_s29, %s1669_s13  ;;  %p1678_p4 = scmp.lt.s32.totalorder %s1669_s13, %s1669_s13 }
  0x24   : > { %p1672_p9 = pnand %p1670_p7, %p1658_p12  ;;  %p1679_p8 = por %p1678_p4, %p1677_p1 }
  0x26   : > { %p1673_p6 = pneg %p1672_p9 }
  0x28   : > { %p1680_p2 = pnand %p1679_p8, %p1673_p6 }
  0x2a   : > { %1683 = shalt.err (!%p1680_p2)
}
  0x2b   : > { %s2331_s14 = smov 64   ;;  %s1860_s21 = smov 4  }
  0x2c   : > { %1558 = dma.hbm_to_vmem [thread:$0]  (!%p1956_p10), %s2322_s1, 1024, %s200_s29, [#allocation7], %s2331_s14, %s2331_s14, %s1860_s21  }
  0x2d   : > { %p40_p1 = scmp.ge.s32.totalorder %s38_s5, 8  ;;  %s51_s6 = sadd.s32 1, %s1844_s17 }
  0x2e   : > { %p58_p2 = scmp.ne.s32.totalorder %s1844_s17, %s1840_s16  ;;  %p59_p4 = scmp.eq.s32.totalorder %s1856_s20, 0 }
  0x2f   : > { %s2354_s5 = smov (%p40_p1, %s38_s5), 0  ;;  %p2339_p8 = scmp.ne.s32.totalorder %s2333_s24, 0 }
  0x30   : > { %p1986_p6 = por %p59_p4, %p58_p2  ;;  %s46_s8 = ssub.s32 %s1852_s19, %s2354_s5 }
  0x31   : > { %p1992_p11 = por %p2339_p8, %p58_p2  ;;  %p1568_p12 = scmp.lt.s32.totalorder %s1856_s20, 8 }
  0x32   : > { %p49_p10 = scmp.eq.s32.totalorder %s46_s8, 0  ;;  %s213_s29 = sand.u32 1, %s1844_s17  }
  0x33   : > { %s1248_s9 = sshll.u32 %s213_s29, 7  ;;  %s1321_s11 = sshll.u32 %s1852_s19, 11 }
  0x34   : > { %s2001_s10 = scalar_select %p49_p10, %s1844_s17, %s51_s6  }
  0x35   : > { %s2007_s22 = scalar_lea.hbm %s2321_s0, %s1321_s11  ;;  %s217_s28 = scalar_lea.vmem [#allocation3], %s1248_s9 }
  0x36   : > { %s225_s14 = sshll.u32 %s217_s28, 4  ;;  %p2013_p13 = pnand %p1568_p12, %p1986_p6  ;;  %s2009_s14 = int_to_ptr.vmem [resolvable:$true] %s225_s14 }
  0x37   : > { %s2017_s6 = scalar_lea.sflag [#allocation4], %s213_s29  ;;  %s1684_s12 = scalar_lea.hbm %s2007_s22, 2048 }
  0x38   : > { %p1685_p0 = scmp.ne.s32.totalorder %s2007_s22, %s1684_s12  ;;  %p1686_p3 = pneg %p2013_p13 }
  0x39   : > { %s1689_s7 = scalar_lea.hbm %s2321_s0, 16384  ;;  %p1690_p9 = scmp.lt.u32.totalorder %s2007_s22, %s2321_s0 }
  0x3a   : > { %p1687_p5 = pnand %p1686_p3, %p1685_p0  ;;  %p1691_p1 = scmp.lt.u32.totalorder %s1689_s7, %s1684_s12 }
  0x3b   : > { %p1693_p4 = scmp.lt.u32.totalorder %s1684_s12, %s2007_s22 }
  0x3c   : > { %p1688_p7 = pneg %p1687_p5  ;;  %p1692_p2 = por %p1691_p1, %p1690_p9 }
  0x3e   : > { %p1694_p6 = por %p1693_p4, %p1692_p2 }
  0x40   : > { %p1695_p8 = pnand %p1694_p6, %p1688_p7 }
  0x42   : > { %1698 = shalt.err (!%p1695_p8)
}
  0x43   : > { %s1699_s29 = scalar_lea.vmem %s2009_s14, 2048  ;;  %s1861_s9 = smov [#allocation3]  }
  0x44   : > { %p1700_p12 = scmp.ne.s32.totalorder %s2009_s14, %s1699_s29  ;;  %s1704_s11 = sshll.u32 %s1861_s9, 4  ;;  %s1705_s11 = int_to_ptr.vmem [resolvable:$false] %s1704_s11 }
  0x45   : > { %s1706_s13 = scalar_lea.vmem %s1705_s11, 4096  ;;  %p1707_p5 = scmp.lt.s32.totalorder %s2009_s14, %s1705_s11 }
  0x46   : > { %p1702_p10 = pnand %p1700_p12, %p1686_p3  ;;  %p1708_p9 = scmp.lt.s32.totalorder %s1706_s13, %s1699_s29 }
  0x48   : > { %p1703_p0 = pneg %p1702_p10  ;;  %p1709_p1 = por %p1708_p9, %p1707_p5 }
  0x4a   : > { %p1710_p2 = pnand %p1709_p1, %p1703_p0 }
  0x4c   : > { %1713 = shalt.err (!%p1710_p2)
}
  0x4d   : > { %s2342_s12 = smov 64   ;;  %p2343_p3 = scmp.ne.s32.totalorder %s2336_s27, 0 }
  0x4e   : > { %1562 = dma.hbm_to_vmem [thread:$0]  (!%p2013_p13), %s2007_s22, 2048, %s2009_s14, %s2017_s6, %s2342_s12, %s2342_s12, %s1860_s21  }
  0x4f   : > { %237 = sbr.rel (%p2343_p3) target bundleno = 482 (0x1e2), region = 28  ;;  %s2051_s7 = sand.u32 (!%p2343_p3), 1, %s1840_s16  }
  0x50   : > { %s1252_s28 = sshll.u32 (!%p2343_p3), %s2051_s7, 7  ;;  %s240_s29 = scalar_lea.sflag (!%p2343_p3), [#allocation4], %s2051_s7 }
  0x51   : > { %s2057_s8 = scalar_lea.vmem (!%p2343_p3), [#allocation3], %s1252_s28  ;;  %p2344_p7 = scmp.ne.s32.totalorder (!%p2343_p3), %s2334_s25, 0 }
  0x56   : > { %1819 = dma.done.wait (%p2344_p7), %s240_s29, 2048  }
  0x57   : > { %1821 = vsyncadd (%p2344_p7), %s240_s29, 4294965248  ;;  %p2345_p13 = scmp.ne.s32.totalorder %s2332_s23, 0 }
  0x59   : > { %1823 = dma.done.wait (%p2345_p13), [#allocation7], 1024  }
  0x5a   : > { %1825 = vsyncadd (%p2345_p13), [#allocation7], 4294966272  ;;  %p312_p4 = scmp.eq.s32.totalorder %s1848_s18, 0  ;;  %v1862_v0 = vmov 0.0   ;;  %s2070_s23 = scalar_lea.vmem [#allocation8], %s1252_s28 }
  0x5b   : > { %280 = vst [vmem:[#allocation2] sm:$0xff] %v1862_v0  ;;  %281 = vst [vmem:[#allocation2 + $0x8] sm:$0xff] %v1862_v0  ;;  %v1863_v1 = vmov (%p312_p4), 0.0  }
  0x5c   : > { %282 = vst [vmem:[#allocation2 + $0x10] sm:$0xff] %v1862_v0  ;;  %283 = vst [vmem:[#allocation2 + $0x18] sm:$0xff] %v1862_v0 }
  0x5d   : > { %284 = vst [vmem:[#allocation2 + $0x20] sm:$0xff] %v1862_v0  ;;  %285 = vst [vmem:[#allocation2 + $0x28] sm:$0xff] %v1862_v0 }
  0x5e   : > { %286 = vst [vmem:[#allocation2 + $0x30] sm:$0xff] %v1862_v0  ;;  %287 = vst [vmem:[#allocation2 + $0x38] sm:$0xff] %v1862_v0 }
  0x5f   : > { %288 = vst [vmem:[#allocation2 + $0x40] sm:$0xff] %v1862_v0  ;;  %289 = vst [vmem:[#allocation2 + $0x48] sm:$0xff] %v1862_v0 }
  0x60   : > { %290 = vst [vmem:[#allocation2 + $0x50] sm:$0xff] %v1862_v0  ;;  %291 = vst [vmem:[#allocation2 + $0x58] sm:$0xff] %v1862_v0 }
  0x61   : > { %292 = vst [vmem:[#allocation2 + $0x60] sm:$0xff] %v1862_v0  ;;  %293 = vst [vmem:[#allocation2 + $0x68] sm:$0xff] %v1862_v0 }
  0x62   : > { %294 = vst [vmem:[#allocation2 + $0x70] sm:$0xff] %v1862_v0  ;;  %295 = vst [vmem:[#allocation2 + $0x78] sm:$0xff] %v1862_v0 }
  0x63   : > { %296 = vst [vmem:[#allocation2 + $0x80] sm:$0xff] %v1862_v0  ;;  %297 = vst [vmem:[#allocation2 + $0x88] sm:$0xff] %v1862_v0 }
  0x64   : > { %298 = vst [vmem:[#allocation2 + $0x90] sm:$0xff] %v1862_v0  ;;  %299 = vst [vmem:[#allocation2 + $0x98] sm:$0xff] %v1862_v0  ;;  %316 = sbr.rel (!%p312_p4) target bundleno = 108 (0x6c), region = 44 }
  0x65   : > { %300 = vst [vmem:[#allocation2 + $0xa0] sm:$0xff] %v1862_v0  ;;  %301 = vst [vmem:[#allocation2 + $0xa8] sm:$0xff] %v1862_v0 }
  0x66   : > { %302 = vst [vmem:[#allocation2 + $0xb0] sm:$0xff] %v1862_v0  ;;  %303 = vst [vmem:[#allocation2 + $0xb8] sm:$0xff] %v1862_v0 }
  0x67   : > { %304 = vst [vmem:[#allocation2 + $0xc0] sm:$0xff] %v1862_v0  ;;  %305 = vst [vmem:[#allocation2 + $0xc8] sm:$0xff] %v1862_v0 }
  0x68   : > { %306 = vst [vmem:[#allocation2 + $0xd0] sm:$0xff] %v1862_v0  ;;  %307 = vst [vmem:[#allocation2 + $0xd8] sm:$0xff] %v1862_v0 }
  0x69   : > { %308 = vst [vmem:[#allocation2 + $0xe0] sm:$0xff] %v1862_v0  ;;  %309 = vst [vmem:[#allocation2 + $0xe8] sm:$0xff] %v1862_v0 }
  0x6a   : > { %310 = vst [vmem:[#allocation2 + $0xf0] sm:$0xff] %v1862_v0  ;;  %311 = vst [vmem:[#allocation2 + $0xf8] sm:$0xff] %v1862_v0 }
  0x6b   : > { %317 = vst [vmem:[#allocation9] sm:$0x1] %v1863_v1  ;;  %318 = vst [vmem:[#allocation11] sm:$0x1] %v1863_v1 }
  0x6c PF: > { %v1632_v2 = vld [vmem:[#allocation6] sm:$0xff]   ;;  %v1633_v3 = vld [vmem:[#allocation6 + $0x8] sm:$0xff]   ;;  %v1634_v4 = vld [vmem:[#allocation6 + $0x10] sm:$0xff]   ;;  %s1355_s25 = sshll.u32 %s1848_s18, 11  ;;  %s1090_s27 = sshll.u32 %s2070_s23, 4  ;;  %s2170_s27 = int_to_ptr.vmem [resolvable:$true] %s1090_s27 }
  0x6d   : > { %1475 = vmatprep.subr.bf16.mxu0 %v1632_v2  ;;  %1523 = vmatprep.subr.bf16.mxu1 %v1632_v2  ;;  %v1635_v5 = vld [vmem:[#allocation6 + $0x18] sm:$0xff]   ;;  %v1640_v6 = vld [vmem:[%s2057_s8] sm:$0xff]   ;;  %v1637_v8 = vld [vmem:[#allocation6 + $0x28] sm:$0xff]   ;;  %s2168_s21 = scalar_lea.hbm %s2323_s2, %s1355_s25  ;;  %s1076_s22 = scalar_lea.sflag [#allocation5], %s2051_s7 }
  0x6e   : > { %1476 = vmatpush3.bf16.msra.mxu0 %v1632_v2  ;;  %1531 = vmatpush3.bf16.msra.mxu1 %v1632_v2  ;;  %v1636_v7 = vld [vmem:[#allocation6 + $0x20] sm:$0xff]   ;;  %v1638_v10 = vld [vmem:[#allocation6 + $0x30] sm:$0xff]   ;;  %v1639_v11 = vld [vmem:[#allocation6 + $0x38] sm:$0xff]   ;;  %s1714_s6 = scalar_lea.vmem %s2170_s27, 2048  ;;  %s1864_s9 = smov [#allocation8]  }
  0x6f   : > { %1477 = vmatprep.subr.bf16.mxu0 %v1633_v3  ;;  %1524 = vmatprep.subr.bf16.mxu1 %v1633_v3  ;;  %v1648_v9 = vld [vmem:[%s2057_s8 + $0x40] sm:$0xff]   ;;  %v1641_v12 = vld [vmem:[%s2057_s8 + $0x8] sm:$0xff]   ;;  %v1642_v14 = vld [vmem:[%s2057_s8 + $0x10] sm:$0xff]   ;;  %p1715_p6 = scmp.ne.s32.totalorder %s2170_s27, %s1714_s6  ;;  %s1718_s11 = sshll.u32 %s1864_s9, 4  ;;  %s1719_s11 = int_to_ptr.vmem [resolvable:$false] %s1718_s11 }
  0x70   : > { %1491 = vmatprep.mubr.bf16.mxu0 %v1640_v6  ;;  %1507 = vmatprep.mubr.bf16.mxu1 %v1648_v9  ;;  %v1649_v13 = vld [vmem:[%s2057_s8 + $0x48] sm:$0xff]   ;;  %v1650_v15 = vld [vmem:[%s2057_s8 + $0x50] sm:$0xff]   ;;  %v1643_v16 = vld [vmem:[%s2057_s8 + $0x18] sm:$0xff]   ;;  %s1720_s13 = scalar_lea.vmem %s1719_s11, 4096  ;;  %p1721_p10 = scmp.lt.s32.totalorder %s2170_s27, %s1719_s11 }
  0x71   : > { %v1651_v17 = vld [vmem:[%s2057_s8 + $0x58] sm:$0xff]   ;;  %v1644_v18 = vld [vmem:[%s2057_s8 + $0x20] sm:$0xff]   ;;  %v1645_v20 = vld [vmem:[%s2057_s8 + $0x28] sm:$0xff]   ;;  %p1716_p8 = pnand %p1715_p6, %p1992_p11  ;;  %p1722_p0 = scmp.lt.s32.totalorder %s1720_s13, %s1714_s6 }
  0x72   : > { %1478 = vmatpush3.bf16.msra.mxu0 %v1633_v3  ;;  %1532 = vmatpush3.bf16.msra.mxu1 %v1633_v3  ;;  %v1652_v19 = vld [vmem:[%s2057_s8 + $0x60] sm:$0xff]   ;;  %v1653_v21 = vld [vmem:[%s2057_s8 + $0x68] sm:$0xff]   ;;  %v1646_v22 = vld [vmem:[%s2057_s8 + $0x30] sm:$0xff]  }
  0x73   : > { %1479 = vmatprep.subr.bf16.mxu0 %v1634_v4  ;;  %1525 = vmatprep.subr.bf16.mxu1 %v1634_v4  ;;  %v1654_v23 = vld [vmem:[%s2057_s8 + $0x70] sm:$0xff]   ;;  %v1647_v24 = vld [vmem:[%s2057_s8 + $0x38] sm:$0xff]   ;;  %v319_v28 = vld [vmem:[#allocation2] sm:$0xff]  ;;  %p1717_p12 = pneg %p1716_p8  ;;  %p1723_p5 = por %p1722_p0, %p1721_p10 }
  0x74   : > { %v1655_v25 = vld [vmem:[%s2057_s8 + $0x78] sm:$0xff]   ;;  %v321_v26 = vld [vmem:[#allocation2 + $0x10] sm:$0xff]  ;;  %v335_v29 = vld [vmem:[#allocation2 + $0x80] sm:$0xff] }
  0x75   : > { %v337_v27 = vld [vmem:[#allocation2 + $0x90] sm:$0xff]  ;;  %v322_v31 = vld [vmem:[#allocation2 + $0x18] sm:$0xff]  ;;  %v320_v36 = vld [vmem:[#allocation2 + $0x8] sm:$0xff]  ;;  %p1724_p9 = pnand %p1723_p5, %p1717_p12 }
  0x76   : > { %1480 = vmatpush3.bf16.msra.mxu0 %v1634_v4  ;;  %1533 = vmatpush3.bf16.msra.mxu1 %v1634_v4  ;;  %v338_v33 = vld [vmem:[#allocation2 + $0x98] sm:$0xff]  ;;  %v336_v39 = vld [vmem:[#allocation2 + $0x88] sm:$0xff]  ;;  %v325_v56 = vld [vmem:[#allocation2 + $0x30] sm:$0xff] }
  0x77   : > { %1481 = vmatprep.subr.bf16.mxu0 %v1635_v5  ;;  %1526 = vmatprep.subr.bf16.mxu1 %v1635_v5  ;;  %v341_v58 = vld [vmem:[#allocation2 + $0xb0] sm:$0xff]  ;;  %v323_v59 = vld [vmem:[#allocation2 + $0x20] sm:$0xff]  ;;  %v326_v1 = vld [vmem:[#allocation2 + $0x38] sm:$0xff] }
  0x78   : > { %v339_v60 = vld [vmem:[#allocation2 + $0xa0] sm:$0xff]  ;;  %v342_v3 = vld [vmem:[#allocation2 + $0xb8] sm:$0xff] }
  0x7a   : > { %1482 = vmatpush3.bf16.msra.mxu0 %v1635_v5  ;;  %1534 = vmatpush3.bf16.msra.mxu1 %v1635_v5 }
  0x7b   : > { %1483 = vmatprep.subr.bf16.mxu0 %v1636_v7  ;;  %1527 = vmatprep.subr.bf16.mxu1 %v1636_v7 }
  0x7e   : > { %1484 = vmatpush3.bf16.msra.mxu0 %v1636_v7  ;;  %1535 = vmatpush3.bf16.msra.mxu1 %v1636_v7  ;;  %v324_v7 = vld [vmem:[#allocation2 + $0x28] sm:$0xff] }
  0x7f   : > { %1485 = vmatprep.subr.bf16.mxu0 %v1637_v8  ;;  %1528 = vmatprep.subr.bf16.mxu1 %v1637_v8 }
  0x82   : > { %1486 = vmatpush3.bf16.msra.mxu0 %v1637_v8  ;;  %1536 = vmatpush3.bf16.msra.mxu1 %v1637_v8 }
  0x83   : > { %1487 = vmatprep.subr.bf16.mxu0 %v1638_v10  ;;  %1529 = vmatprep.subr.bf16.mxu1 %v1638_v10 }
  0x86   : > { %1488 = vmatpush3.bf16.msra.mxu0 %v1638_v10  ;;  %1537 = vmatpush3.bf16.msra.mxu1 %v1638_v10 }
  0x87   : > { %1489 = vmatprep.subr.bf16.mxu0 %v1639_v11  ;;  %1530 = vmatprep.subr.bf16.mxu1 %v1639_v11 }
  0x8a   : > { %1490 = vmatpush3.bf16.msra.mxu0 %v1639_v11  ;;  %1538 = vmatpush3.bf16.msra.mxu1 %v1639_v11 }
  0x8d   : > { %1492 = vmatmul.mubr.bf16.vlgmr.msra.gmra.mrb[0].mxu0 %v1641_v12  ;;  %1508 = vmatmul.mubr.bf16.vlgmr.msra.gmra.mrb[0].mxu1 %v1649_v13 }
  0x8e   : > { %1495 = vmatprep.mubr.bf16.mxu0 %v1642_v14  ;;  %1511 = vmatprep.mubr.bf16.mxu1 %v1650_v15 }
  0x95   : > { %1496 = vmatmul.mubr.bf16.gmra.mrb[4].mxu0 %v1643_v16  ;;  %1512 = vmatmul.mubr.bf16.gmra.mrb[4].mxu1 %v1651_v17  ;;  %v340_v16 = vld [vmem:[#allocation2 + $0xa8] sm:$0xff] }
  0x96   : > { %1499 = vmatprep.mubr.bf16.mxu0 %v1644_v18  ;;  %1515 = vmatprep.mubr.bf16.mxu1 %v1652_v19 }
  0x9d   : > { %1500 = vmatmul.mubr.bf16.gmra.mrb[8].mxu0 %v1645_v20  ;;  %1516 = vmatmul.mubr.bf16.gmra.mrb[8].mxu1 %v1653_v21 }
  0x9e   : > { %1503 = vmatprep.mubr.bf16.mxu0 %v1646_v22  ;;  %1519 = vmatprep.mubr.bf16.mxu1 %v1654_v23 }
  0xa5   : > { %1504 = vmatmul.mubr.bf16.gmra.mrb[12].mxu0 %v1647_v24  ;;  %1520 = vmatmul.mubr.bf16.gmra.mrb[12].mxu1 %v1655_v25 }
 0x160   : > { %v1493_v30 = vpop.f32.mrb[0].mxu0  ;;  %v1509_v32 = vpop.f32.mrb[0].mxu1 }
 0x161   : > { %v706_v34 = vadd.f32 %v1493_v30, %v321_v26  ;;  %v577_v35 = vpop.f32.mrb[1].mxu0  ;;  %v2090_v37 = vadd.f32 %v1509_v32, %v337_v27  ;;  %v641_v38 = vpop.f32.mrb[1].mxu1  ;;  %v329_v32 = vld [vmem:[#allocation2 + $0x50] sm:$0xff] }
 0x162   : > { %v704_v40 = vadd.f32 %v577_v35, %v319_v28  ;;  %v1494_v41 = vpop.f32.mrb[2].mxu0  ;;  %v2092_v42 = vadd.f32 %v641_v38, %v335_v29  ;;  %v1510_v43 = vpop.f32.mrb[2].mxu1  ;;  %v343_v35 = vld [vmem:[#allocation2 + $0xc0] sm:$0xff] }
 0x163   : > { %738 = vst [vmem:[#allocation2 + $0x10] sm:$0xff] %v706_v34  ;;  %v707_v44 = vadd.f32 %v1494_v41, %v322_v31  ;;  %v580_v45 = vpop.f32.mrb[3].mxu0  ;;  %754 = vst [vmem:[#allocation2 + $0x90] sm:$0xff] %v2090_v37  ;;  %v2095_v46 = vadd.f32 %v1510_v43, %v338_v33  ;;  %v644_v47 = vpop.f32.mrb[3].mxu1  ;;  %v1006_v61 = vmul.f32 %v706_v34, %v706_v34  ;;  %v345_v33 = vld [vmem:[#allocation2 + $0xd0] sm:$0xff]  ;;  %v330_v43 = vld [vmem:[#allocation2 + $0x58] sm:$0xff] }
 0x164   : > { %736 = vst [vmem:[#allocation2] sm:$0xff] %v704_v40  ;;  %v705_v48 = vadd.f32 %v580_v45, %v320_v36  ;;  %752 = vst [vmem:[#allocation2 + $0x80] sm:$0xff] %v2092_v42  ;;  %v2098_v49 = vadd.f32 %v644_v47, %v336_v39  ;;  %v1004_v50 = vmul.f32 %v704_v40, %v704_v40  ;;  %v346_v45 = vld [vmem:[#allocation2 + $0xd8] sm:$0xff] }
 0x165   : > { %739 = vst [vmem:[#allocation2 + $0x18] sm:$0xff] %v707_v44  ;;  %v1364_v51 = vpack.c.bf16 %v707_v44, %v706_v34  ;;  %755 = vst [vmem:[#allocation2 + $0x98] sm:$0xff] %v2095_v46  ;;  %v1404_v52 = vpack.c.bf16 %v2095_v46, %v2090_v37  ;;  %v1007_v4 = vmul.f32 %v707_v44, %v707_v44 }
 0x166   : > { %737 = vst [vmem:[#allocation2 + $0x8] sm:$0xff] %v705_v48  ;;  %v1359_v53 = vpack.c.bf16 %v705_v48, %v704_v40  ;;  %v964_v54 = vadd.f32 %v705_v48, %v704_v40  ;;  %v1005_v55 = vmul.f32 %v705_v48, %v705_v48  ;;  %753 = vst [vmem:[#allocation2 + $0x88] sm:$0xff] %v2098_v49 }
 0x167   : > { %v1399_v57 = vpack.c.bf16 %v2098_v49, %v2092_v42  ;;  %1436 = vst [vmem:[%s2070_s23 + $0x8] sm:$0xff] %v1364_v51   ;;  %1444 = vst [vmem:[%s2070_s23 + $0x48] sm:$0xff] %v1404_v52   ;;  %v328_v51 = vld [vmem:[#allocation2 + $0x48] sm:$0xff] }
 0x168   : > { %1360 = vst [vmem:[%s2070_s23] sm:$0xff] %v1359_v53   ;;  %v965_v62 = vadd.f32 %v964_v54, %v706_v34  ;;  %v1036_v63 = vadd.f32 %v1005_v55, %v1004_v50  ;;  %v1497_v0 = vpop.f32.mrb[4].mxu0  ;;  %v1513_v2 = vpop.f32.mrb[4].mxu1  ;;  %v327_v34 = vld [vmem:[#allocation2 + $0x40] sm:$0xff] }
 0x169   : > { %1443 = vst [vmem:[%s2070_s23 + $0x40] sm:$0xff] %v1399_v57   ;;  %v710_v5 = vadd.f32 %v1497_v0, %v325_v56  ;;  %v593_v6 = vpop.f32.mrb[5].mxu0  ;;  %v2110_v8 = vadd.f32 %v1513_v2, %v341_v58  ;;  %v657_v9 = vpop.f32.mrb[5].mxu1 }
 0x16a   : > { %v1037_v10 = vadd.f32 %v1036_v63, %v1006_v61  ;;  %v708_v11 = vadd.f32 %v593_v6, %v323_v59  ;;  %v966_v12 = vadd.f32 %v965_v62, %v707_v44  ;;  %v1498_v13 = vpop.f32.mrb[6].mxu0  ;;  %v2112_v14 = vadd.f32 %v657_v9, %v339_v60  ;;  %v1514_v15 = vpop.f32.mrb[6].mxu1  ;;  %v344_v60 = vld [vmem:[#allocation2 + $0xc8] sm:$0xff] }
 0x16b   : > { %742 = vst [vmem:[#allocation2 + $0x30] sm:$0xff] %v710_v5  ;;  %v711_v17 = vadd.f32 %v1498_v13, %v326_v1  ;;  %v596_v18 = vpop.f32.mrb[7].mxu0  ;;  %758 = vst [vmem:[#allocation2 + $0xb0] sm:$0xff] %v2110_v8  ;;  %v2115_v19 = vadd.f32 %v1514_v15, %v342_v3  ;;  %v660_v20 = vpop.f32.mrb[7].mxu1  ;;  %v1010_v38 = vmul.f32 %v710_v5, %v710_v5  ;;  %v333_v13 = vld [vmem:[#allocation2 + $0x70] sm:$0xff] }
 0x16c   : > { %740 = vst [vmem:[#allocation2 + $0x20] sm:$0xff] %v708_v11  ;;  %v967_v21 = vadd.f32 %v966_v12, %v708_v11  ;;  %v1008_v22 = vmul.f32 %v708_v11, %v708_v11  ;;  %v1038_v23 = vadd.f32 %v1037_v10, %v1007_v4  ;;  %v709_v24 = vadd.f32 %v596_v18, %v324_v7  ;;  %v349_v15 = vld [vmem:[#allocation2 + $0xf0] sm:$0xff] }
 0x16d   : > { %756 = vst [vmem:[#allocation2 + $0xa0] sm:$0xff] %v2112_v14  ;;  %743 = vst [vmem:[#allocation2 + $0x38] sm:$0xff] %v711_v17  ;;  %v1374_v25 = vpack.c.bf16 %v711_v17, %v710_v5  ;;  %v2119_v26 = vadd.f32 %v660_v20, %v340_v16  ;;  %v1414_v27 = vpack.c.bf16 %v2115_v19, %v2110_v8  ;;  %v331_v16 = vld [vmem:[#allocation2 + $0x60] sm:$0xff] }
 0x16e   : > { %759 = vst [vmem:[#allocation2 + $0xb8] sm:$0xff] %v2115_v19  ;;  %v1039_v28 = vadd.f32 %v1038_v23, %v1008_v22  ;;  %741 = vst [vmem:[#allocation2 + $0x28] sm:$0xff] %v709_v24  ;;  %v1369_v29 = vpack.c.bf16 %v709_v24, %v708_v11  ;;  %v968_v30 = vadd.f32 %v967_v21, %v709_v24 }
 0x16f   : > { %v1009_v31 = vmul.f32 %v709_v24, %v709_v24  ;;  %1438 = vst [vmem:[%s2070_s23 + $0x18] sm:$0xff] %v1374_v25   ;;  %757 = vst [vmem:[#allocation2 + $0xa8] sm:$0xff] %v2119_v26  ;;  %v1409_v36 = vpack.c.bf16 %v2119_v26, %v2112_v14  ;;  %v1011_v47 = vmul.f32 %v711_v17, %v711_v17  ;;  %v334_v24 = vld [vmem:[#allocation2 + $0x78] sm:$0xff] }
 0x170   : > { %1446 = vst [vmem:[%s2070_s23 + $0x58] sm:$0xff] %v1414_v27   ;;  %1437 = vst [vmem:[%s2070_s23 + $0x10] sm:$0xff] %v1369_v29   ;;  %v969_v39 = vadd.f32 %v968_v30, %v710_v5  ;;  %v1501_v41 = vpop.f32.mrb[8].mxu0  ;;  %v1517_v44 = vpop.f32.mrb[8].mxu1  ;;  %v350_v27 = vld [vmem:[#allocation2 + $0xf8] sm:$0xff] }
 0x171   : > { %v1040_v40 = vadd.f32 %v1039_v28, %v1009_v31  ;;  %v714_v48 = vadd.f32 %v1501_v41, %v329_v32  ;;  %v609_v50 = vpop.f32.mrb[9].mxu0  ;;  %v2129_v52 = vadd.f32 %v1517_v44, %v345_v33  ;;  %v673_v53 = vpop.f32.mrb[9].mxu1  ;;  %1445 = vst [vmem:[%s2070_s23 + $0x50] sm:$0xff] %v1409_v36   ;;  %v332_v31 = vld [vmem:[#allocation2 + $0x68] sm:$0xff] }
 0x172   : > { %v712_v55 = vadd.f32 %v609_v50, %v327_v34  ;;  %v970_v56 = vadd.f32 %v969_v39, %v711_v17  ;;  %v1502_v57 = vpop.f32.mrb[10].mxu0  ;;  %v2132_v58 = vadd.f32 %v673_v53, %v343_v35  ;;  %v1518_v59 = vpop.f32.mrb[10].mxu1  ;;  %v347_v17 = vld [vmem:[#allocation2 + $0xe0] sm:$0xff]  ;;  %v348_v41 = vld [vmem:[#allocation2 + $0xe8] sm:$0xff] }
 0x173   : > { %v1041_v54 = vadd.f32 %v1040_v40, %v1010_v38  ;;  %746 = vst [vmem:[#allocation2 + $0x50] sm:$0xff] %v714_v48  ;;  %v715_v61 = vadd.f32 %v1502_v57, %v330_v43  ;;  %v612_v62 = vpop.f32.mrb[11].mxu0  ;;  %762 = vst [vmem:[#allocation2 + $0xd0] sm:$0xff] %v2129_v52  ;;  %v2135_v63 = vadd.f32 %v1518_v59, %v346_v45  ;;  %v676_v0 = vpop.f32.mrb[11].mxu1 }
 0x174   : > { %744 = vst [vmem:[#allocation2 + $0x40] sm:$0xff] %v712_v55  ;;  %v971_v1 = vadd.f32 %v970_v56, %v712_v55  ;;  %v1012_v2 = vmul.f32 %v712_v55, %v712_v55  ;;  %v713_v4 = vadd.f32 %v612_v62, %v328_v51  ;;  %760 = vst [vmem:[#allocation2 + $0xc0] sm:$0xff] %v2132_v58 }
 0x175   : > { %v1042_v3 = vadd.f32 %v1041_v54, %v1011_v47  ;;  %747 = vst [vmem:[#allocation2 + $0x58] sm:$0xff] %v715_v61  ;;  %v1384_v5 = vpack.c.bf16 %v715_v61, %v714_v48  ;;  %763 = vst [vmem:[#allocation2 + $0xd8] sm:$0xff] %v2135_v63  ;;  %v2139_v6 = vadd.f32 %v676_v0, %v344_v60 }
 0x176   : > { %v1424_v7 = vpack.c.bf16 %v2135_v63, %v2129_v52  ;;  %745 = vst [vmem:[#allocation2 + $0x48] sm:$0xff] %v713_v4  ;;  %v1379_v10 = vpack.c.bf16 %v713_v4, %v712_v55  ;;  %v972_v11 = vadd.f32 %v971_v1, %v713_v4  ;;  %v1013_v12 = vmul.f32 %v713_v4, %v713_v4 }
 0x177   : > { %v1043_v9 = vadd.f32 %v1042_v3, %v1012_v2  ;;  %1440 = vst [vmem:[%s2070_s23 + $0x28] sm:$0xff] %v1384_v5   ;;  %761 = vst [vmem:[#allocation2 + $0xc8] sm:$0xff] %v2139_v6  ;;  %v1419_v18 = vpack.c.bf16 %v2139_v6, %v2132_v58  ;;  %v1014_v20 = vmul.f32 %v714_v48, %v714_v48 }
 0x178   : > { %1448 = vst [vmem:[%s2070_s23 + $0x68] sm:$0xff] %v1424_v7   ;;  %1439 = vst [vmem:[%s2070_s23 + $0x20] sm:$0xff] %v1379_v10   ;;  %v973_v21 = vadd.f32 %v972_v11, %v714_v48  ;;  %v1505_v23 = vpop.f32.mrb[12].mxu0  ;;  %v1521_v25 = vpop.f32.mrb[12].mxu1  ;;  %v1015_v28 = vmul.f32 %v715_v61, %v715_v61  ;;  %v1020_v7 = vmul.f32 %v2092_v42, %v2092_v42 }
 0x179   : > { %v1044_v22 = vadd.f32 %v1043_v9, %v1013_v12  ;;  %v718_v29 = vadd.f32 %v1505_v23, %v333_v13  ;;  %v625_v30 = vpop.f32.mrb[13].mxu0  ;;  %v2149_v32 = vadd.f32 %v1521_v25, %v349_v15  ;;  %v689_v33 = vpop.f32.mrb[13].mxu1  ;;  %1447 = vst [vmem:[%s2070_s23 + $0x60] sm:$0xff] %v1419_v18  }
 0x17a   : > { %v716_v35 = vadd.f32 %v625_v30, %v331_v16  ;;  %v974_v36 = vadd.f32 %v973_v21, %v715_v61  ;;  %v1506_v38 = vpop.f32.mrb[14].mxu0  ;;  %v2152_v39 = vadd.f32 %v689_v33, %v347_v17  ;;  %v1522_v40 = vpop.f32.mrb[14].mxu1 }
 0x17b   : > { %v1045_v34 = vadd.f32 %v1044_v22, %v1014_v20  ;;  %750 = vst [vmem:[#allocation2 + $0x70] sm:$0xff] %v718_v29  ;;  %v719_v43 = vadd.f32 %v1506_v38, %v334_v24  ;;  %v628_v44 = vpop.f32.mrb[15].mxu0  ;;  %766 = vst [vmem:[#allocation2 + $0xf0] sm:$0xff] %v2149_v32  ;;  %v2155_v45 = vadd.f32 %v1522_v40, %v350_v27  ;;  %v692_v47 = vpop.f32.mrb[15].mxu1 }
 0x17c   : > { %748 = vst [vmem:[#allocation2 + $0x60] sm:$0xff] %v716_v35  ;;  %v975_v48 = vadd.f32 %v974_v36, %v716_v35  ;;  %v1016_v50 = vmul.f32 %v716_v35, %v716_v35  ;;  %v717_v53 = vadd.f32 %v628_v44, %v332_v31  ;;  %764 = vst [vmem:[#allocation2 + $0xe0] sm:$0xff] %v2152_v39 }
 0x17d   : > { %v1046_v51 = vadd.f32 %v1045_v34, %v1015_v28  ;;  %751 = vst [vmem:[#allocation2 + $0x78] sm:$0xff] %v719_v43  ;;  %v1394_v54 = vpack.c.bf16 %v719_v43, %v718_v29  ;;  %767 = vst [vmem:[#allocation2 + $0xf8] sm:$0xff] %v2155_v45  ;;  %v2161_v55 = vadd.f32 %v692_v47, %v348_v41 }
 0x17e   : > { %v1434_v56 = vpack.c.bf16 %v2155_v45, %v2149_v32  ;;  %749 = vst [vmem:[#allocation2 + $0x68] sm:$0xff] %v717_v53  ;;  %v1389_v59 = vpack.c.bf16 %v717_v53, %v716_v35  ;;  %v976_v60 = vadd.f32 %v975_v48, %v717_v53  ;;  %v1017_v61 = vmul.f32 %v717_v53, %v717_v53 }
 0x17f   : > { %v1047_v57 = vadd.f32 %v1046_v51, %v1016_v50  ;;  %1442 = vst [vmem:[%s2070_s23 + $0x38] sm:$0xff] %v1394_v54   ;;  %765 = vst [vmem:[#allocation2 + $0xe8] sm:$0xff] %v2161_v55  ;;  %v1429_v62 = vpack.c.bf16 %v2161_v55, %v2152_v39  ;;  %v1018_v0 = vmul.f32 %v718_v29, %v718_v29 }
 0x180   : > { %1450 = vst [vmem:[%s2070_s23 + $0x78] sm:$0xff] %v1434_v56   ;;  %1441 = vst [vmem:[%s2070_s23 + $0x30] sm:$0xff] %v1389_v59   ;;  %v977_v1 = vadd.f32 %v976_v60, %v718_v29  ;;  %v1019_v3 = vmul.f32 %v719_v43, %v719_v43 }
 0x181   : > { %v1048_v2 = vadd.f32 %v1047_v57, %v1017_v61  ;;  %1449 = vst [vmem:[%s2070_s23 + $0x70] sm:$0xff] %v1429_v62  }
 0x182   : > { %v978_v5 = vadd.f32 %v977_v1, %v719_v43 }
 0x183   : > { %v1049_v4 = vadd.f32 %v1048_v2, %v1018_v0 }
 0x184   : > { %1727 = shalt.err (!%p1724_p9)
}
 0x185   : > { %s1728_s12 = scalar_lea.hbm %s2168_s21, 2048  ;;  %s1732_s8 = scalar_lea.hbm %s2323_s2, 16384 }
 0x186   : > { %p1729_p1 = scmp.ne.s32.totalorder %s2168_s21, %s1728_s12  ;;  %p1733_p7 = scmp.lt.u32.totalorder %s2168_s21, %s2323_s2 }
 0x187   : > { %p1734_p13 = scmp.lt.u32.totalorder %s1732_s8, %s1728_s12  ;;  %p1736_p6 = scmp.lt.u32.totalorder %s1728_s12, %s2168_s21 }
 0x188   : > { %p1730_p2 = pnand %p1729_p1, %p1992_p11 }
 0x189   : > { %p1735_p4 = por %p1734_p13, %p1733_p7 }
 0x18a   : > { %p1731_p3 = pneg %p1730_p2 }
 0x18b   : > { %p1737_p8 = por %p1736_p6, %p1735_p4 }
 0x18d   : > { %p1738_p12 = pnand %p1737_p8, %p1731_p3 }
 0x18f   : > { %1741 = shalt.err (!%p1738_p12)
}
 0x190   : > { %s1865_s18 = smov 64   ;;  %s1866_s14 = smov 4   ;;  %v979_v9 = vadd.f32 %v978_v5, %v2092_v42  ;;  %v1050_v10 = vadd.f32 %v1049_v4, %v1019_v3  ;;  %v1021_v13 = vmul.f32 %v2098_v49, %v2098_v49  ;;  %v1022_v15 = vmul.f32 %v2090_v37, %v2090_v37  ;;  %v963_v2 = vld [vmem:[#allocation9] sm:$0x1]  ;;  %v1003_v4 = vld [vmem:[#allocation11] sm:$0x1] }
 0x191   : > { %1545 = dma.vmem_to_hbm [thread:$0]  (%p1992_p11), %s2170_s27, 2048, %s2168_s21, %s1076_s22, %s1865_s18, %s1865_s18, %s1866_s14   ;;  %v1023_v18 = vmul.f32 %v2095_v46, %v2095_v46  ;;  %v1024_v42 = vmul.f32 %v2112_v14, %v2112_v14  ;;  %v1025_v24 = vmul.f32 %v2119_v26, %v2119_v26  ;;  %v1026_v27 = vmul.f32 %v2110_v8, %v2110_v8 }
 0x192   : > { %v1051_v11 = vadd.f32 %v1050_v10, %v1020_v7  ;;  %v980_v12 = vadd.f32 %v979_v9, %v2098_v49  ;;  %v1027_v29 = vmul.f32 %v2115_v19, %v2115_v19  ;;  %v1029_v34 = vmul.f32 %v2139_v6, %v2139_v6  ;;  %s1867_s30 = smov [#allocation9]   ;;  %s1868_s27 = smov [#allocation11]  }
 0x193   : > { %v1030_v36 = vmul.f32 %v2129_v52, %v2129_v52  ;;  %v1031_v40 = vmul.f32 %v2135_v63, %v2135_v63  ;;  %v1033_v47 = vmul.f32 %v2161_v55, %v2161_v55  ;;  %v1034_v50 = vmul.f32 %v2149_v32, %v2149_v32  ;;  %s1106_s7 = sshll.u32 %s1867_s30, 4  ;;  %s1119_s21 = sshll.u32 %s1868_s27, 4  ;;  %s1107_s7 = int_to_ptr.vmem [resolvable:$true] %s1106_s7  ;;  %s2251_s21 = int_to_ptr.vmem [resolvable:$true] %s1119_s21 }
 0x194   : > { %v1052_v16 = vadd.f32 %v1051_v11, %v1021_v13  ;;  %v981_v17 = vadd.f32 %v980_v12, %v2090_v37  ;;  %v1035_v53 = vmul.f32 %v2155_v45, %v2155_v45  ;;  %s1742_s22 = scalar_lea.vmem %s1107_s7, 16  ;;  %p2346_p10 = scmp.ne.s32.totalorder %s2333_s24, 0 }
 0x195   : > { %p1743_p11 = scmp.ne.s32.totalorder %s1107_s7, %s1742_s22  ;;  %s1748_s6 = scalar_lea.vmem %s1107_s7, 32 }
 0x196   : > { %v982_v20 = vadd.f32 %v981_v17, %v2095_v46  ;;  %v1053_v21 = vadd.f32 %v1052_v16, %v1022_v15  ;;  %p1749_p9 = scmp.lt.s32.totalorder %s1107_s7, %s1107_s7  ;;  %p1750_p1 = scmp.lt.s32.totalorder %s1748_s6, %s1742_s22 }
 0x197   : > { %p1744_p0 = pnand %p1743_p11, %p2346_p10 }
 0x198   : > { %v983_v22 = vadd.f32 %v982_v20, %v2112_v14  ;;  %v1054_v23 = vadd.f32 %v1053_v21, %v1023_v18  ;;  %v1028_v14 = vmul.f32 %v2132_v58, %v2132_v58  ;;  %p1751_p2 = por %p1750_p1, %p1749_p9 }
 0x199   : > { %p1745_p5 = pneg %p1744_p0 }
 0x19a   : > { %v984_v49 = vadd.f32 %v983_v22, %v2119_v26  ;;  %v1055_v25 = vadd.f32 %v1054_v23, %v1024_v42 }
 0x19b   : > { %p1752_p3 = pnand %p1751_p2, %p1745_p5 }
 0x19c   : > { %v985_v37 = vadd.f32 %v984_v49, %v2110_v8  ;;  %v1056_v28 = vadd.f32 %v1055_v25, %v1025_v24 }
 0x19e   : > { %v986_v46 = vadd.f32 %v985_v37, %v2115_v19  ;;  %v1057_v30 = vadd.f32 %v1056_v28, %v1026_v27 }
 0x1a0   : > { %v987_v31 = vadd.f32 %v986_v46, %v2132_v58  ;;  %v1058_v33 = vadd.f32 %v1057_v30, %v1027_v29  ;;  %v1032_v58 = vmul.f32 %v2152_v39, %v2152_v39 }
 0x1a2   : > { %v988_v26 = vadd.f32 %v987_v31, %v2139_v6  ;;  %v1059_v35 = vadd.f32 %v1058_v33, %v1028_v14 }
 0x1a4   : > { %v989_v8 = vadd.f32 %v988_v26, %v2129_v52  ;;  %v1060_v38 = vadd.f32 %v1059_v35, %v1029_v34 }
 0x1a6   : > { %v990_v19 = vadd.f32 %v989_v8, %v2135_v63  ;;  %v1061_v41 = vadd.f32 %v1060_v38, %v1030_v36 }
 0x1a8   : > { %v991_v43 = vadd.f32 %v990_v19, %v2152_v39  ;;  %v1062_v44 = vadd.f32 %v1061_v41, %v1031_v40 }
 0x1aa   : > { %v992_v6 = vadd.f32 %v991_v43, %v2161_v55  ;;  %v1063_v48 = vadd.f32 %v1062_v44, %v1032_v58 }
 0x1ac   : > { %v993_v52 = vadd.f32 %v992_v6, %v2149_v32  ;;  %v1064_v51 = vadd.f32 %v1063_v48, %v1033_v47 }
 0x1ae   : > { %v994_v63 = vadd.f32 %v993_v52, %v2155_v45  ;;  %v1065_v54 = vadd.f32 %v1064_v51, %v1034_v50 }
 0x1b0   : > { %v995_v39 = vrot.slane %v994_v63, 4  ;;  %v1066_v56 = vadd.f32 %v1065_v54, %v1035_v53 }
 0x1b2   : > { %v996_v57 = vadd.f32 %v995_v39, %v994_v63  ;;  %v1067_v59 = vrot.slane %v1066_v56, 4 }
 0x1b4   : > { %v997_v60 = vrot.slane %v996_v57, 2  ;;  %v1068_v61 = vadd.f32 %v1067_v59, %v1066_v56 }
 0x1b6   : > { %v998_v55 = vadd.f32 %v997_v60, %v996_v57  ;;  %v1069_v62 = vrot.slane %v1068_v61, 2 }
 0x1b8   : > { %v999_v0 = vrot.slane %v998_v55, 1  ;;  %v1070_v1 = vadd.f32 %v1069_v62, %v1068_v61 }
 0x1ba   : > { %v1000_v32 = vadd.f32 %v999_v0, %v998_v55  ;;  %v1071_v3 = vrot.slane %v1070_v1, 1 }
 0x1bc   : > { %v1001_v45 = vadd.f32 %v1000_v32, %v963_v2  ;;  %v1072_v5 = vadd.f32 %v1071_v3, %v1070_v1 }
 0x1be   : > { %1002 = vst [vmem:[#allocation9] sm:$0x1] %v1001_v45  ;;  %v1073_v7 = vadd.f32 %v1072_v5, %v1003_v4 }
 0x1bf   : > { %1755 = shalt.err (!%p1752_p3)
}
 0x1c0   : > { %s1756_s13 = scalar_lea.hbm %s2324_s3, 16 }
 0x1c1   : > { %p1757_p7 = scmp.ne.s32.totalorder %s2324_s3, %s1756_s13  ;;  %p1762_p6 = scmp.lt.u32.totalorder %s1756_s13, %s2324_s3 }
 0x1c3   : > { %p1758_p13 = pnand %p1757_p7, %p2346_p10 }
 0x1c5   : > { %p1759_p4 = pneg %p1758_p13 }
 0x1c7   : > { %p1764_p8 = pnand %p1762_p6, %p1759_p4 }
 0x1c9   : > { %1767 = shalt.err (!%p1764_p8)
}
 0x1ca   : > { %1547 = dma.vmem_to_hbm [thread:$0]  (%p2346_p10), %s1107_s7, 16, %s2324_s3, [#allocation10]   ;;  %1074 = vst [vmem:[#allocation11] sm:$0x1] %v1073_v7 }
 0x1cb   : > { %s1768_s18 = scalar_lea.vmem %s2251_s21, 16  ;;  %s1774_s14 = scalar_lea.vmem %s2251_s21, 32 }
 0x1cc   : > { %p1769_p12 = scmp.ne.s32.totalorder %s2251_s21, %s1768_s18  ;;  %p1775_p5 = scmp.lt.s32.totalorder %s2251_s21, %s2251_s21 }
 0x1cd   : > { %p1776_p9 = scmp.lt.s32.totalorder %s1774_s14, %s1768_s18 }
 0x1ce   : > { %p1770_p11 = pnand %p1769_p12, %p2346_p10 }
 0x1cf   : > { %p1777_p1 = por %p1776_p9, %p1775_p5 }
 0x1d0   : > { %p1771_p0 = pneg %p1770_p11 }
 0x1d2   : > { %p1778_p2 = pnand %p1777_p1, %p1771_p0 }
 0x1d4   : > { %1781 = shalt.err (!%p1778_p2)
}
 0x1d5   : > { %s1782_s22 = scalar_lea.hbm %s2325_s4, 16 }
 0x1d6   : > { %p1783_p3 = scmp.ne.s32.totalorder %s2325_s4, %s1782_s22  ;;  %p1788_p4 = scmp.lt.u32.totalorder %s1782_s22, %s2325_s4 }
 0x1d8   : > { %p1784_p7 = pnand %p1783_p3, %p2346_p10 }
 0x1da   : > { %p1785_p13 = pneg %p1784_p7 }
 0x1dc   : > { %p1790_p6 = pnand %p1788_p4, %p1785_p13 }
 0x1de   : > { %1793 = shalt.err (!%p1790_p6)
}
 0x1df   : > { %1549 = dma.vmem_to_hbm [thread:$0]  (%p2346_p10), %s2251_s21, 16, %s2325_s4, [#allocation10]  }
 0x1e0   : > { %1827 = dma.done.wait (%p2346_p10), [#allocation10], 32  }
 0x1e1   : > { %1829 = vsyncadd (%p2346_p10), [#allocation10], 4294967264 }
 0x1e2 PF: > { %p1574_p8 = scmp.ge.s32.totalorder %s1856_s20, 2  ;;  %s1139_s28 = sand.u32 1, %s1836_s15  }
 0x1e3   : > { %p2347_p12 = scmp.ne.s32.totalorder %s2335_s26, 0  ;;  %s1140_s29 = scalar_lea.sflag [#allocation5], %s1139_s28 }
 0x1e5   : > { %p1564_p11 = pnand %p1574_p8, %p2347_p12 }
 0x1e7   : > { %1831 = dma.done.wait (!%p1564_p11), %s1140_s29, 2048  }
 0x1e8   : > { %1833 = vsyncadd (!%p1564_p11), %s1140_s29, 4294965248  ;;  %s23_s20 = sadd.s32 1, %s1856_s20   ;;  %s2348_s15 = smov %s1840_s16 }
 0x1e9   : > { %p20_p0 = scmp.ge.s32.totalorder %s23_s20, 10   ;;  %s2349_s16 = smov %s1844_s17 }
 0x1ea   : > { %s2350_s17 = smov %s2001_s10  ;;  %s2351_s18 = smov %s1852_s19 }
 0x1eb   : > { %s2352_s19 = smov %s2354_s5  ;;  %22 = sbr.rel (!%p20_p0) target bundleno = 8 (0x8), region = 108 }
 0x1f2   :  { %1145 = vsyncpa [#allocation4], 1 }
 0x1f3   :  { %1147 = vsyncpa [#allocation4 + $0x1], 1 }
 0x1f4   :  { %1148 = vsyncpa [#allocation7], 1 }
 0x1f5   :  { %1149 = vsyncpa [#allocation5], 1 }
 0x1f6   :  { %1151 = vsyncpa [#allocation5 + $0x1], 1 }
 0x1f7   :  { %1152 = vsyncpa [#allocation10], 1 }

</bundles_post_ra>
